<compile_context>
chip_gen: v7x
topology: tpu7x:2x2x1
jax: 0.10.0
libtpu: 0.0.40
codegen_flags: <defaults>
</compile_context>

<pallas_src>
import functools

import jax
import jax.numpy as jnp
from jax import lax
from jax.experimental import pallas as pl
from jax.experimental.pallas import tpu as pltpu

EPSILON = 1e-8


def _minibatch_stddev_tiled_kernel(x_ref, o_ref, acc_ref, *, G, M, W_in, T):
    """One column tile of the flattened problem.

    x_ref:   (N, T) block of the (N, C*L) input (index clamped for tail blocks).
    o_ref:   (N, T) block of the (N, (C+1)*L) output.
    acc_ref: (M, 1) f32 running sum over feature columns of the per-subgroup std.
    """
    i = pl.program_id(0)
    N = G * M
    n_in_blocks = (W_in + T - 1) // T
    last_in_block = n_in_blocks - 1

    x = x_ref[...]  # native dtype, pass-through path

    @pl.when(i == 0)
    def _init():
        acc_ref[...] = jnp.zeros_like(acc_ref)

    # ---- accumulate per-subgroup stddev for blocks that contain data cols ----
    @pl.when(i <= last_in_block)
    def _accumulate():
        xf = x.astype(jnp.float32)                     # f32 only on reduce path
        y = xf.reshape(G, M, T)                        # torch view(G, -1, ...)
        mu = jnp.mean(y, axis=0, keepdims=True)        # (1, M, T)
        std = jnp.sqrt(jnp.mean((y - mu) ** 2, axis=0) + EPSILON)  # (M, T)
        col = i * T + lax.broadcasted_iota(jnp.int32, (1, T), 1)
        std = jnp.where(col < W_in, std, 0.0)          # mask pad / tail columns
        acc_ref[...] += jnp.sum(std, axis=1, keepdims=True)

    # ---- write this output block -------------------------------------------
    pure_copy = (i + 1) * T <= W_in                    # every column is data

    @pl.when(pure_copy)
    def _copy():
        o_ref[...] = x                                 # streamed native-dtype copy

    @pl.when(jnp.logical_not(pure_copy))
    def _finalize():
        # Reached only once all data columns have been accumulated (sequential
        # "arbitrary" grid axis), so the stat is final here.
        stat = acc_ref[...] * (1.0 / W_in)             # (M, 1) f32
        feat = jnp.tile(stat, (G, 1))                  # (N, 1): row n -> stat[n % M]
        feat = jnp.broadcast_to(feat, (N, T)).astype(o_ref.dtype)
        col = i * T + lax.broadcasted_iota(jnp.int32, (1, T), 1)
        o_ref[...] = jnp.where(col < W_in, x, feat)    # data cols | stddev channel


def _minibatch_stddev_small_kernel(x_ref, o_ref, *, G, M, W_in):
    """Fallback for tiny feature widths (C*L < 128): single whole-array block."""
    x = x_ref[...]
    N = x.shape[0]
    L_extra = o_ref.shape[1] - W_in

    xf = x.astype(jnp.float32)
    y = xf.reshape(G, M, W_in)
    mu = jnp.mean(y, axis=0, keepdims=True)
    std = jnp.sqrt(jnp.mean((y - mu) ** 2, axis=0) + EPSILON)      # (M, W_in)
    stat = jnp.sum(std, axis=1, keepdims=True) * (1.0 / W_in)      # (M, 1)
    feat = jnp.tile(stat, (G, 1))                                  # (N, 1)

    # Two direct region stores: no concat temporary, no f32 round-trip of x.
    o_ref[:, :W_in] = x
    o_ref[:, W_in:] = jnp.broadcast_to(feat, (N, L_extra)).astype(o_ref.dtype)


def minibatch_stddev(x, group_size=4, block_cols=None):
    """Pallas equivalent of MinibatchStddev.forward for NCW inputs (N, C, L)."""
    N, C, L = x.shape
    gs = group_size if group_size != 0 else 1_000_000
    G = min(N, int(gs))
    if N % G != 0:
        raise ValueError("batch size must be divisible by the group size")
    M = N // G
    W_in = C * L
    W_out = (C + 1) * L
    dtype = x.dtype

    x2 = x.reshape(N, W_in)  # contiguous -> free reshape
    out_shape = jax.ShapeDtypeStruct((N, W_out), dtype)

    if W_in < 128:
        # Tiny feature width: whole arrays are a fraction of a vreg row anyway.
        kernel = functools.partial(
            _minibatch_stddev_small_kernel, G=G, M=M, W_in=W_in)
        out2 = pl.pallas_call(
            kernel,
            out_shape=out_shape,
            in_specs=[pl.BlockSpec(memory_space=pltpu.MemorySpace.VMEM)],
            out_specs=pl.BlockSpec(memory_space=pltpu.MemorySpace.VMEM),
        )(x2)
        return out2.reshape(N, C + 1, L)

    # Lane-dense tile width: multiple of 128, <= W_in, ~256 KiB per input block.
    if block_cols is None:
        target_bytes = 256 * 1024
        block_cols = max(128, (target_bytes // (N * dtype.itemsize)) // 128 * 128)
    T = int(max(128, min(block_cols, (W_in // 128) * 128)))

    n_in_blocks = (W_in + T - 1) // T
    grid = ((W_out + T - 1) // T,)

    kernel = functools.partial(
        _minibatch_stddev_tiled_kernel, G=G, M=M, W_in=W_in, T=T)

    out2 = pl.pallas_call(
        kernel,
        out_shape=out_shape,
        grid_spec=pltpu.PrefetchScalarGridSpec(
            num_scalar_prefetch=0,
            grid=grid,
            # Clamp input block index so pure-tail output blocks stay in bounds.
            in_specs=[pl.BlockSpec(
                (N, T), lambda i: (0, jnp.minimum(i, n_in_blocks - 1)))],
            out_specs=pl.BlockSpec((N, T), lambda i: (0, i)),
            scratch_shapes=[pltpu.VMEM((M, 1), jnp.float32)],
        ),
        compiler_params=pltpu.CompilerParams(
            # The single grid axis carries the stat accumulator -> sequential.
            dimension_semantics=("arbitrary",),
            vmem_limit_bytes=32 * 1024 * 1024,
        ),
    )(x2)
    return out2.reshape(N, C + 1, L)


def _reference(x, group_size=4):
    # Pure-JAX reference reproducing the torch semantics exactly.
    N, C, L = x.shape
    gs = group_size if group_size != 0 else 1_000_000
    G = min(N, int(gs))
    M = N // G
    xf = x.astype(jnp.float32)
    y = xf.reshape(G, M, C, L)
    y = y - y.mean(axis=0, keepdims=True)
    y = jnp.sqrt((y ** 2).mean(axis=0) + EPSILON)                  # (M, C, L)
    y = y.mean(axis=1, keepdims=True).mean(axis=2, keepdims=True)  # (M, 1, 1)
    y = jnp.tile(y, (G, 1, L))                                     # (N, 1, L)
    return jnp.concatenate([x, y.astype(x.dtype)], axis=1)


if __name__ == "__main__":
    key = jax.random.PRNGKey(0)
    k1, k2 = jax.random.split(key)

    # Main (tiled) path: N=8, C=6, L=128 -> W_in=768, group_size=4 -> M=2.
    x1 = jax.random.normal(k1, (8, 6, 128), dtype=jnp.float32)
    ref1 = _reference(x1, group_size=4)

    out1 = jax.block_until_ready(minibatch_stddev(x1, group_size=4))
    assert out1.shape == (8, 7, 128), out1.shape
    assert jnp.allclose(out1, ref1, atol=1e-5, rtol=1e-5)

    # Same input, smaller tiles: exercises mixed data/stat block (T=512)
    # and the clamped pure-tail block path (T=128).
    out1b = jax.block_until_ready(minibatch_stddev(x1, group_size=4, block_cols=512))
    assert jnp.allclose(out1b, ref1, atol=1e-5, rtol=1e-5)
    out1c = jax.block_until_ready(minibatch_stddev(x1, group_size=4, block_cols=128))
    assert jnp.allclose(out1c, ref1, atol=1e-5, rtol=1e-5)

    # Small-feature fallback path (C*L = 64 < 128), the original toy shape.
    x2 = jax.random.normal(k2, (8, 4, 16), dtype=jnp.float32)
    out2 = jax.block_until_ready(minibatch_stddev(x2, group_size=4))
    ref2 = _reference(x2, group_size=4)
    assert out2.shape == (8, 5, 16), out2.shape
    assert jnp.allclose(out2, ref2, atol=1e-5, rtol=1e-5)

    print("KERNEL_OK")
</pallas_src>

<mosaic_0001>
module attributes {stable_mosaic.version = 11 : i64} {
  func.func @_minibatch_stddev_tiled_kernel(%arg0: i32, %arg1: memref<8x768xf32, #tpu.memory_space<vmem>>, %arg2: memref<8x768xf32, #tpu.memory_space<vmem>>, %arg3: memref<2x1xf32, #tpu.memory_space<vmem>>) attributes {dimension_semantics = [#tpu.dimension_semantics<arbitrary>], iteration_bounds = array<i64: 2>, scalar_prefetch = 0 : i64, scratch_operands = 1 : i64, tpu.core_type = #tpu.core_type<tc>, window_params = [{transform_indices = @transform_0, window_bounds = array<i64: 8, 768>}, {transform_indices = @transform_1, window_bounds = array<i64: 8, 768>}]} {
    %c0 = arith.constant 0 : index
    %c0_0 = arith.constant 0 : index
    %0 = vector.load %arg1[%c0, %c0_0] : memref<8x768xf32, #tpu.memory_space<vmem>>, vector<8x768xf32>
    %c0_i32 = arith.constant 0 : i32
    %1 = arith.cmpi eq, %arg0, %c0_i32 : i32
    %2 = arith.extui %1 : i1 to i32
    %c0_i32_1 = arith.constant 0 : i32
    %3 = arith.cmpi ne, %2, %c0_i32_1 : i32
    scf.if %3 {
      %cst = arith.constant 0.000000e+00 : f32
      %15 = vector.broadcast %cst : f32 to vector<2x1xf32>
      %c0_7 = arith.constant 0 : index
      %c0_8 = arith.constant 0 : index
      %16 = vector.load %arg3[%c0_7, %c0_8] : memref<2x1xf32, #tpu.memory_space<vmem>>, vector<2x1xf32>
      tpu.vector_store %arg3[%c0_7, %c0_8], %15 {strides = array<i32>} : memref<2x1xf32, #tpu.memory_space<vmem>>, vector<2x1xf32>,
    } else {
    }
    %c0_i32_2 = arith.constant 0 : i32
    %4 = arith.cmpi sle, %arg0, %c0_i32_2 : i32
    %5 = arith.extui %4 : i1 to i32
    %c0_i32_3 = arith.constant 0 : i32
    %6 = arith.cmpi ne, %5, %c0_i32_3 : i32
    scf.if %6 {
      %15 = vector.shape_cast %0 : vector<8x768xf32> to vector<4x2x768xf32>
      %cst = arith.constant dense<0.000000e+00> : vector<2x768xf32>
      %16 = vector.multi_reduction <add>, %15, %cst [0] : vector<4x2x768xf32> to vector<2x768xf32>
      %17 = vector.shape_cast %16 : vector<2x768xf32> to vector<1x2x768xf32>
      %cst_7 = arith.constant 4.000000e+00 : f32
      %18 = vector.broadcast %cst_7 : f32 to vector<1x2x768xf32>
      %19 = arith.divf %17, %18 : vector<1x2x768xf32>
      %20 = vector.broadcast %19 : vector<1x2x768xf32> to vector<4x2x768xf32>
      %21 = arith.subf %15, %20 : vector<4x2x768xf32>
      %22 = arith.mulf %21, %21 : vector<4x2x768xf32>
      %cst_8 = arith.constant dense<0.000000e+00> : vector<2x768xf32>
      %23 = vector.multi_reduction <add>, %22, %cst_8 [0] : vector<4x2x768xf32> to vector<2x768xf32>
      %cst_9 = arith.constant 4.000000e+00 : f32
      %24 = vector.broadcast %cst_9 : f32 to vector<2x768xf32>
      %25 = arith.divf %23, %24 : vector<2x768xf32>
      %cst_10 = arith.constant 9.99999993E-9 : f32
      %26 = vector.broadcast %cst_10 : f32 to vector<2x768xf32>
      %27 = arith.addf %25, %26 : vector<2x768xf32>
      %28 = math.sqrt %27 : vector<2x768xf32>
      %c768_i32_11 = arith.constant 768 : i32
      %29 = arith.muli %arg0, %c768_i32_11 : i32
      %30 = tpu.iota {dimensions = array<i32: 1>} : vector<1x768xi32>
      %31 = vector.broadcast %29 : i32 to vector<1x768xi32>
      %32 = arith.addi %31, %30 : vector<1x768xi32>
      %c768_i32_12 = arith.constant 768 : i32
      %33 = vector.broadcast %c768_i32_12 : i32 to vector<1x768xi32>
      %34 = arith.cmpi slt, %32, %33 : vector<1x768xi32>
      %cst_13 = arith.constant 0.000000e+00 : f32
      %35 = vector.shape_cast %34 : vector<1x768xi1> to vector<1x768xi1>
      %36 = vector.broadcast %35 : vector<1x768xi1> to vector<2x768xi1>
      %37 = vector.broadcast %cst_13 : f32 to vector<2x768xf32>
      %38 = arith.select %36, %28, %37 : vector<2x768xi1>, vector<2x768xf32>
      %c0_14 = arith.constant 0 : index
      %c0_15 = arith.constant 0 : index
      %39 = vector.load %arg3[%c0_14, %c0_15] : memref<2x1xf32, #tpu.memory_space<vmem>>, vector<2x1xf32>
      %cst_16 = arith.constant dense<0.000000e+00> : vector<2xf32>
      %40 = vector.multi_reduction <add>, %38, %cst_16 [1] : vector<2x768xf32> to vector<2xf32>
      %41 = vector.shape_cast %40 : vector<2xf32> to vector<2x1xf32>
      %42 = arith.addf %39, %41 : vector<2x1xf32>
      %c0_17 = arith.constant 0 : index
      %c0_18 = arith.constant 0 : index
      %43 = vector.load %arg3[%c0_17, %c0_18] : memref<2x1xf32, #tpu.memory_space<vmem>>, vector<2x1xf32>
      tpu.vector_store %arg3[%c0_17, %c0_18], %42 {strides = array<i32>} : memref<2x1xf32, #tpu.memory_space<vmem>>, vector<2x1xf32>,
    } else {
    }
    %c1_i32 = arith.constant 1 : i32
    %7 = arith.addi %arg0, %c1_i32 : i32
    %c768_i32 = arith.constant 768 : i32
    %8 = arith.muli %7, %c768_i32 : i32
    %c768_i32_4 = arith.constant 768 : i32
    %9 = arith.cmpi sle, %8, %c768_i32_4 : i32
    %10 = arith.extui %9 : i1 to i32
    %c0_i32_5 = arith.constant 0 : i32
    %11 = arith.cmpi ne, %10, %c0_i32_5 : i32
    scf.if %11 {
      %c0_7 = arith.constant 0 : index
      %c0_8 = arith.constant 0 : index
      %15 = vector.load %arg2[%c0_7, %c0_8] : memref<8x768xf32, #tpu.memory_space<vmem>>, vector<8x768xf32>
      tpu.vector_store %arg2[%c0_7, %c0_8], %0 {strides = array<i32>} : memref<8x768xf32, #tpu.memory_space<vmem>>, vector<8x768xf32>,
    } else {
    }
    %true = arith.constant true
    %12 = arith.xori %9, %true : i1
    %13 = arith.extui %12 : i1 to i32
    %c0_i32_6 = arith.constant 0 : i32
    %14 = arith.cmpi ne, %13, %c0_i32_6 : i32
    scf.if %14 {
      %c0_7 = arith.constant 0 : index
      %c0_8 = arith.constant 0 : index
      %15 = vector.load %arg3[%c0_7, %c0_8] : memref<2x1xf32, #tpu.memory_space<vmem>>, vector<2x1xf32>
      %cst = arith.constant 0.00130208337 : f32
      %16 = vector.broadcast %cst : f32 to vector<2x1xf32>
      %17 = arith.mulf %15, %16 : vector<2x1xf32>
      %18 = tpu.concatenate %17, %17, %17, %17 in 0 : vector<2x1xf32>, vector<2x1xf32>, vector<2x1xf32>, vector<2x1xf32> -> vector<8x1xf32>
      %19 = vector.shape_cast %18 : vector<8x1xf32> to vector<8x1xf32>
      %20 = vector.broadcast %19 : vector<8x1xf32> to vector<8x768xf32>
      %c768_i32_9 = arith.constant 768 : i32
      %21 = arith.muli %arg0, %c768_i32_9 : i32
      %22 = tpu.iota {dimensions = array<i32: 1>} : vector<1x768xi32>
      %23 = vector.broadcast %21 : i32 to vector<1x768xi32>
      %24 = arith.addi %23, %22 : vector<1x768xi32>
      %c768_i32_10 = arith.constant 768 : i32
      %25 = vector.broadcast %c768_i32_10 : i32 to vector<1x768xi32>
      %26 = arith.cmpi slt, %24, %25 : vector<1x768xi32>
      %27 = vector.shape_cast %26 : vector<1x768xi1> to vector<1x768xi1>
      %28 = vector.broadcast %27 : vector<1x768xi1> to vector<8x768xi1>
      %29 = arith.select %28, %0, %20 : vector<8x768xi1>, vector<8x768xf32>
      %c0_11 = arith.constant 0 : index
      %c0_12 = arith.constant 0 : index
      %30 = vector.load %arg2[%c0_11, %c0_12] : memref<8x768xf32, #tpu.memory_space<vmem>>, vector<8x768xf32>
      tpu.vector_store %arg2[%c0_11, %c0_12], %29 {strides = array<i32>} : memref<8x768xf32, #tpu.memory_space<vmem>>, vector<8x768xf32>,
    } else {
    }
    return
  }
  func.func @transform_0(%arg0: i32) -> (i32, i32) {
    %c0_i32 = arith.constant 0 : i32
    %0 = arith.minsi %arg0, %c0_i32 : i32
    %c0_i32_0 = arith.constant 0 : i32
    %c0_i32_1 = arith.constant 0 : i32
    return %c0_i32_0, %0 : i32, i32
  }
  func.func @transform_1(%arg0: i32) -> (i32, i32) {
    %c0_i32 = arith.constant 0 : i32
    %c0_i32_0 = arith.constant 0 : i32
    return %c0_i32, %arg0 : i32, i32
  }
}

</mosaic_0001>

<bundles_post_ra>
// kernel: tpu_custom_call.1
= control target key start
LH: loop header
LB: loop body
LE: loop exit
PB: predicated region body
PF: predicated region fallthrough
CT: control target
= control target key end

     0   :  { %6 = vsyncpa [#allocation4], 0  ;;  %s1609_s0 = inlined_call_operand.hbm [shape: f32[8,768], index: 0, kind: input, shape index: {}]   ;;  %s1610_s1 = inlined_call_operand.hbm [shape: f32[8,896], index: 1, kind: output, shape index: {}]  }
   0x1   :  { %8 = vsyncpa [#allocation4 + $0x1], 0 }
   0x2   :  { %9 = vsyncpa [#allocation5], 0 }
   0x3   :  { %11 = vsyncpa [#allocation5 + $0x1], 0  ;;  %s1157_s6 = smov 0   ;;  %s1159_s7 = smov 0  }
   0x4   :  { %s1161_s8 = smov 0   ;;  %s1163_s9 = smov 0  }
   0x5   :  { %s1165_s10 = smov 0   ;;  %s1167_s11 = smov 0  }
   0x6   :  { %s1169_s12 = smov 0  }
   0x7 LB: > { %s1191_s13 = sadd.s32 4294967295, %s1140_s12   ;;  %s910_s14 = sadd.s32 4294967294, %s1140_s12   ;;  %s1140_s12 = sphi %s1169_s12, %s1629_s12   ;;  %s1136_s11 = sphi %s1167_s11, %s1628_s11   ;;  %s1132_s10 = sphi %s1165_s10, %s1627_s10   ;;  %s1128_s9 = sphi %s1163_s9, %s1626_s9   ;;  %s1124_s8 = sphi %s1161_s8, %s1625_s8   ;;  %s1120_s7 = sphi %s1159_s7, %s1624_s7   ;;  %s1116_s6 = sphi %s1157_s6, %s1623_s6  }
   0x8   : > { %s1195_s15 = sadd.s32 1, %s1140_s12   ;;  %p21_p0 = scmp.lt.s32.totalorder %s1140_s12, 0 }
   0x9   : > { %p23_p1 = scmp.lt.s32.totalorder %s1195_s15, 0  ;;  %s28_s16 = sadd.s32 1, %s1136_s11 }
   0xa   : > { %s1201_s17 = scalar_select %p21_p0, %s1140_s12, 0 }
   0xb   : > { %s24_s18 = scalar_select %p23_p1, %s1195_s15, 0 }
   0xc   : > { %p35_p2 = scmp.ne.s32.totalorder %s1136_s11, %s1132_s10  ;;  %p36_p3 = scmp.eq.s32.totalorder %s1140_s12, 0 }
   0xd   : > { %s25_s19 = ssub.s32 %s1201_s17, %s24_s18  ;;  %p41_p4 = scmp.ne.s32.totalorder %s1132_s10, %s1128_s9 }
   0xe   : > { %p26_p5 = scmp.eq.s32.totalorder %s25_s19, 0  ;;  %p1209_p6 = por %p36_p3, %p35_p2 }
   0xf   : > { %p42_p7 = scmp.eq.s32.totalorder %s1191_s13, 0  ;;  %s51_s21 = ssub.s32 %s1140_s12, %s1195_s15 }
  0x10   : > { %s1217_s22 = scalar_select %p26_p5, %s1136_s11, %s28_s16  }
  0x11   : > { %p1219_p8 = por %p42_p7, %p41_p4  ;;  %p52_p9 = scmp.eq.s32.totalorder %s51_s21, 0 }
  0x12   : > { %s54_s24 = sadd.s32 1, %s1124_s8  ;;  %p64_p10 = scmp.ne.s32.totalorder %s1124_s8, %s1120_s7 }
  0x13   : > { %s1227_s25 = scalar_select %p52_p9, %s1124_s8, %s54_s24  }
  0x14   : > { %p65_p11 = scmp.eq.s32.totalorder %s1191_s13, 1  ;;  %p70_p12 = scmp.ne.s32.totalorder %s1120_s7, %s1116_s6 }
  0x15   : > { %p71_p13 = scmp.eq.s32.totalorder %s910_s14, 1  ;;  %p946_p2 = scmp.lt.s32.totalorder %s1140_s12, 2 }
  0x16   : > { %p1233_p1 = por %p65_p11, %p64_p10  ;;  %s91_s28 = sand.u32 1, %s1136_s11  }
  0x17   : > { %p1238_p3 = por %p71_p13, %p70_p12  ;;  %s932_s29 = smul.u32 48, %s91_s28 }
  0x18   : > { %s1613_s26 = scalar_select %p1233_p1, 1, 0 }
  0x19   : > { %s1614_s27 = scalar_select %p1238_p3, 1, 0 }
  0x1a   : > { %s930_s30 = smul.u32 768, %s1201_s17  ;;  %p1246_p4 = pnand %p946_p2, %p1209_p6 }
  0x1b   : > { %s95_s9 = scalar_lea.vmem [#allocation3], %s932_s29  ;;  %s92_s16 = scalar_lea.sflag [#allocation4], %s91_s28 }
  0x1c   : > { %s1254_s5 = scalar_lea.hbm %s1609_s0, %s930_s30  ;;  %s105_s14 = sshll.u32 %s95_s9, 4  ;;  %s1256_s14 = int_to_ptr.vmem [resolvable:$true] %s105_s14 }
  0x1d   : > { %s1020_s17 = scalar_lea.hbm %s1254_s5, 768  ;;  %p1022_p7 = pneg %p1246_p4 }
  0x1e   : > { %p1021_p6 = scmp.ne.s32.totalorder %s1254_s5, %s1020_s17  ;;  %s1025_s20 = scalar_lea.hbm %s1609_s0, 768 }
  0x1f   : > { %p1026_p11 = scmp.lt.u32.totalorder %s1254_s5, %s1609_s0  ;;  %p1027_p12 = scmp.lt.u32.totalorder %s1025_s20, %s1020_s17 }
  0x20   : > { %p1023_p9 = pnand %p1022_p7, %p1021_p6  ;;  %p1029_p2 = scmp.lt.u32.totalorder %s1020_s17, %s1254_s5 }
  0x21   : > { %p1028_p13 = por %p1027_p12, %p1026_p11 }
  0x22   : > { %p1024_p10 = pneg %p1023_p9 }
  0x23   : > { %p1030_p0 = por %p1029_p2, %p1028_p13 }
  0x25   : > { %p1031_p5 = pnand %p1030_p0, %p1024_p10 }
  0x27   : > { %1034 = shalt.err (!%p1031_p5)
}
  0x28   : > { %s1035_s28 = scalar_lea.vmem %s1256_s14, 768  ;;  %s1142_s29 = smov [#allocation3]  }
  0x29   : > { %p1036_p6 = scmp.ne.s32.totalorder %s1256_s14, %s1035_s28  ;;  %s1040_s30 = sshll.u32 %s1142_s29, 4  ;;  %s1041_s30 = int_to_ptr.vmem [resolvable:$false] %s1040_s30 }
  0x2a   : > { %s1042_s3 = scalar_lea.vmem %s1041_s30, 1536  ;;  %p1043_p1 = scmp.lt.s32.totalorder %s1256_s14, %s1041_s30 }
  0x2b   : > { %p1038_p9 = pnand %p1036_p6, %p1022_p7  ;;  %p1044_p11 = scmp.lt.s32.totalorder %s1042_s3, %s1035_s28 }
  0x2d   : > { %p1039_p3 = pneg %p1038_p9  ;;  %p1045_p12 = por %p1044_p11, %p1043_p1 }
  0x2f   : > { %p1046_p13 = pnand %p1045_p12, %p1039_p3 }
  0x31   : > { %1049 = shalt.err (!%p1046_p13)
}
  0x32   : > { %941 = dma.hbm_to_vmem [thread:$0]  (!%p1246_p4), %s1254_s5, 768, %s1256_s14, %s92_s16  }
  0x33   : > { %p110_p0 = scmp.lt.s32.totalorder %s1140_s12, 3  ;;  %p1616_p5 = scmp.ge.s32.totalorder %s1140_s12, 1 }
  0x35   : > { %p111_p7 = pnand %p1616_p5, %p110_p0 }
  0x36   : > { %s116_s4 = sand.u32 (!%p111_p7), 1, %s1132_s10  }
  0x37   : > { %114 = sbr.rel (%p111_p7) target bundleno = 496 (0x1f0), region = 24  ;;  %s117_s17 = scalar_lea.sflag (!%p111_p7), [#allocation4], %s116_s4 }
  0x38   : > { %s933_s9 = smul.u32 (!%p111_p7), 48, %s116_s4 }
  0x3a   : > { %s120_s18 = scalar_lea.vmem (!%p111_p7), [#allocation3], %s933_s9 }
  0x3e   : > { %1107 = dma.done.wait (%p1219_p8), %s117_s17, 768  }
  0x3f   : > { %1109 = vsyncadd (%p1219_p8), %s117_s17, 4294966528  ;;  %s136_s2 = sand.u32 1, %s1120_s7   ;;  %v1294_v0 = vld [vmem:[%s120_s18] sm:$0xff]  ;;  %v1296_v1 = vld [vmem:[%s120_s18 + $0x8] sm:$0xff]  ;;  %p915_p8 = scmp.ne.s32.totalorder %s1191_s13, 0 }
  0x40   : > { %s934_s5 = smul.u32 48, %s136_s2  ;;  %v1298_v2 = vld [vmem:[%s120_s18 + $0x10] sm:$0xff]  ;;  %v1300_v3 = vld [vmem:[%s120_s18 + $0x18] sm:$0xff]  ;;  %v1302_v4 = vld [vmem:[%s120_s18 + $0x20] sm:$0xff]  ;;  %vm157_vm0 = vcmask (!%p915_p8), 1024   ;;  %v1143_v6 = vmov (!%p915_p8), 0.0  }
  0x41   : > { %v1304_v5 = vld [vmem:[%s120_s18 + $0x28] sm:$0xff]  ;;  %156 = sbr.rel (%p915_p8) target bundleno = 72 (0x48), region = 32  ;;  %158 = vst.msk [vmem:[#allocation2] sm:$0x3] (!%p915_p8), %vm157_vm0, %v1143_v6 }
  0x42   : > { %s1306_s14 = scalar_lea.vmem [#allocation6], %s934_s5 }
  0x48 PF: > { %p916_p1 = scmp.gt.s32.totalorder %s1191_s13, 0 }
  0x49   : > { %v176_v7 = vlaneseq (!%p916_p1)  ;;  %v1144_v8 = vmov (!%p916_p1), 1983009808   ;;  %v169_v10 = vcombine.low (!%p916_p1), %v1294_v0, %v1296_v1  ;;  %v170_v12 = vcombine.high (!%p916_p1), %v1294_v0, %v1296_v1  ;;  %s682_s23 = smul.u32 (!%p916_p1), 768, %s1191_s13 }
  0x4a   : > { %162 = sbr.rel (%p916_p1) target bundleno = 307 (0x133), region = 36  ;;  %v174_v9 = vunpack.c.l.s4 (!%p916_p1), %v1144_v8  ;;  %v171_v13 = vcombine.low (!%p916_p1), %v1298_v2, %v1300_v3  ;;  %v172_v14 = vcombine.high (!%p916_p1), %v1298_v2, %v1300_v3  ;;  %v205_v16 = vcombine.low (!%p916_p1), %v1302_v4, %v1304_v5 }
  0x4b   : > { %v177_v11 = vshrl.u32 (!%p916_p1), %v176_v7, 7  ;;  %v206_v17 = vcombine.high (!%p916_p1), %v1302_v4, %v1304_v5  ;;  %vm355_vm1 = vcmask (!%p916_p1), 1041408  }
  0x4c   : > { %v175_v15 = vunpack.c.0.s8 (!%p916_p1), %v174_v9 }
  0x4e   : > { %v1323_v18 = vsub.s32 (!%p916_p1), %v175_v15, %v177_v11 }
  0x50   : > { %v179_v19 = vrot.slane (!%p916_p1), %v169_v10, %v1323_v18  ;;  %v186_v20 = vrot.slane (!%p916_p1), %v170_v12, %v1323_v18  ;;  %v193_v21 = vrot.slane (!%p916_p1), %v171_v13, %v1323_v18  ;;  %v200_v22 = vrot.slane (!%p916_p1), %v172_v14, %v1323_v18 }
  0x51   : > { %v1330_v23 = vrot.slane %v205_v16, %v1323_v18  ;;  %v1333_v24 = vrot.slane %v206_v17, %v1323_v18 }
  0x52   : > { %v1335_v25 = vcombine.low %v179_v19, %v193_v21  ;;  %v1337_v26 = vcombine.high %v179_v19, %v193_v21  ;;  %v1339_v27 = vcombine.low %v186_v20, %v200_v22  ;;  %v1341_v28 = vcombine.high %v186_v20, %v200_v22 }
  0x53   : > { %v1345_v29 = vcombine.high %v1330_v23, %v1330_v23  ;;  %v1349_v30 = vcombine.high %v1333_v24, %v1333_v24  ;;  %v917_v31 = vcombine.low %v193_v21, %v193_v21  ;;  %v254_v32 = vrot.slane %v1330_v23, %v1323_v18 }
  0x54   : > { %v238_v33 = vrot.slane %v1335_v25, %v1323_v18  ;;  %v918_v34 = vcombine.high %v193_v21, %v193_v21  ;;  %v263_v35 = vrot.slane %v1337_v26, %v1323_v18  ;;  %v919_v36 = vcombine.low %v200_v22, %v200_v22 }
  0x55   : > { %v245_v37 = vrot.slane %v917_v31, %v1323_v18  ;;  %v255_v38 = vcombine.high %v254_v32, %v254_v32  ;;  %v279_v39 = vrot.slane %v1345_v29, %v1323_v18  ;;  %v288_v40 = vrot.slane %v1339_v27, %v1323_v18 }
  0x56   : > { %v246_v41 = vcombine.high %v238_v33, %v238_v33  ;;  %v270_v42 = vrot.slane %v918_v34, %v1323_v18  ;;  %v271_v43 = vcombine.high %v263_v35, %v263_v35  ;;  %v295_v44 = vrot.slane %v919_v36, %v1323_v18 }
  0x57   : > { %v247_v45 = vcombine.high %v245_v37, %v245_v37  ;;  %v280_v46 = vcombine.high %v279_v39, %v279_v39  ;;  %v296_v47 = vcombine.high %v288_v40, %v288_v40  ;;  %v304_v48 = vrot.slane %v1333_v24, %v1323_v18 }
  0x58   : > { %v272_v49 = vcombine.high %v270_v42, %v270_v42  ;;  %v297_v50 = vcombine.high %v295_v44, %v295_v44  ;;  %v920_v51 = vcombine.high %v200_v22, %v200_v22  ;;  %v313_v52 = vrot.slane %v1341_v28, %v1323_v18 }
  0x59   : > { %v305_v53 = vcombine.high %v304_v48, %v304_v48  ;;  %v329_v54 = vrot.slane %v1349_v30, %v1323_v18  ;;  %v356_v55 = vsel %vm355_vm1, %v238_v33, 0.0  ;;  %v357_v56 = vsel %vm355_vm1, %v263_v35, 0.0 }
  0x5a   : > { %v320_v57 = vrot.slane %v920_v51, %v1323_v18  ;;  %v321_v58 = vcombine.high %v313_v52, %v313_v52  ;;  %v358_v59 = vadd.f32 %v357_v56, %v356_v55  ;;  %v359_v60 = vsel %vm355_vm1, %v288_v40, 0.0 }
  0x5b   : > { %v330_v61 = vcombine.high %v329_v54, %v329_v54  ;;  %v361_v62 = vsel %vm355_vm1, %v313_v52, 0.0  ;;  %v363_v63 = vsel %vm355_vm1, %v246_v41, 0.0  ;;  %v364_v6 = vsel %vm355_vm1, %v271_v43, 0.0 }
  0x5c   : > { %v322_v8 = vcombine.high %v320_v57, %v320_v57  ;;  %v360_v9 = vadd.f32 %v359_v60, %v358_v59  ;;  %v365_v10 = vadd.f32 %v364_v6, %v363_v63  ;;  %v366_v11 = vsel %vm355_vm1, %v296_v47, 0.0 }
  0x5d   : > { %v368_v12 = vsel %vm355_vm1, %v321_v58, 0.0  ;;  %v370_v13 = vsel %vm355_vm1, %v245_v37, 0.0  ;;  %v371_v14 = vsel %vm355_vm1, %v270_v42, 0.0  ;;  %v373_v15 = vsel %vm355_vm1, %v295_v44, 0.0 }
  0x5e   : > { %v362_v16 = vadd.f32 %v361_v62, %v360_v9  ;;  %v367_v17 = vadd.f32 %v366_v11, %v365_v10  ;;  %v372_v19 = vadd.f32 %v371_v14, %v370_v13  ;;  %v375_v20 = vsel %vm355_vm1, %v320_v57, 0.0 }
  0x5f   : > { %v377_v21 = vsel %vm355_vm1, %v247_v45, 0.0  ;;  %v378_v22 = vsel %vm355_vm1, %v272_v49, 0.0  ;;  %v380_v31 = vsel %vm355_vm1, %v297_v50, 0.0  ;;  %v382_v33 = vsel %vm355_vm1, %v322_v8, 0.0 }
  0x60   : > { %v369_v34 = vadd.f32 %v368_v12, %v367_v17  ;;  %v374_v35 = vadd.f32 %v373_v15, %v372_v19  ;;  %v379_v36 = vadd.f32 %v378_v22, %v377_v21  ;;  %v384_v37 = vsel %vm355_vm1, %v254_v32, 0.0 }
  0x61   : > { %v385_v40 = vsel %vm355_vm1, %v279_v39, 0.0  ;;  %v387_v41 = vsel %vm355_vm1, %v304_v48, 0.0  ;;  %v389_v42 = vsel %vm355_vm1, %v329_v54, 0.0  ;;  %v391_v43 = vsel %vm355_vm1, %v255_v38, 0.0 }
  0x62   : > { %v376_v44 = vadd.f32 %v375_v20, %v374_v35  ;;  %v381_v45 = vadd.f32 %v380_v31, %v379_v36  ;;  %v386_v47 = vadd.f32 %v385_v40, %v384_v37  ;;  %v392_v49 = vsel %vm355_vm1, %v280_v46, 0.0 }
  0x63   : > { %v393_v50 = vadd.f32 %v392_v49, %v391_v43  ;;  %v394_v51 = vsel %vm355_vm1, %v305_v53, 0.0  ;;  %v396_v52 = vsel %vm355_vm1, %v330_v61, 0.0  ;;  %v399_v55 = vmul.f32 0.25, %v362_v16 }
  0x64   : > { %v383_v32 = vadd.f32 %v382_v33, %v381_v45  ;;  %v388_v56 = vadd.f32 %v387_v41, %v386_v47  ;;  %v400_v39 = vmul.f32 0.25, %v369_v34  ;;  %v401_v57 = vmul.f32 0.25, %v376_v44 }
  0x65   : > { %v395_v48 = vadd.f32 %v394_v51, %v393_v50  ;;  %v1399_v9 = vand.u32 127, %v176_v7 }
  0x66   : > { %v390_v58 = vadd.f32 %v389_v42, %v388_v56  ;;  %v402_v54 = vmul.f32 0.25, %v383_v32  ;;  %v411_v59 = vcombine.low %v399_v55, %v400_v39 }
  0x67   : > { %v397_v38 = vadd.f32 %v396_v52, %v395_v48 }
  0x68   : > { %v403_v60 = vmul.f32 0.25, %v390_v58  ;;  %v412_v62 = vcombine.low %v401_v57, %v402_v54  ;;  %v419_v63 = vrot.slane %v411_v59, %v1323_v18 }
  0x69   : > { %v404_v46 = vmul.f32 0.25, %v397_v38 }
  0x6a   : > { %v426_v6 = vrot.slane %v412_v62, %v1323_v18 }
  0x6b   : > { %v428_v53 = vcombine.low %v403_v60, %v404_v46 }
  0x6c   : > { %v427_v8 = vcombine.low %v419_v63, %v426_v6 }
  0x6d   : > { %v435_v61 = vrot.slane %v428_v53, %v1323_v18 }
  0x6e   : > { %v438_v10 = vsub.f32 %v1335_v25, %v427_v8  ;;  %v440_v11 = vsub.f32 %v1337_v26, %v427_v8  ;;  %v442_v12 = vsub.f32 %v1339_v27, %v427_v8  ;;  %v444_v13 = vsub.f32 %v1341_v28, %v427_v8 }
  0x6f   : > { %v439_v14 = vsub.f32 %v1330_v23, %v435_v61  ;;  %v441_v15 = vsub.f32 %v1345_v29, %v435_v61  ;;  %v443_v16 = vsub.f32 %v1333_v24, %v435_v61  ;;  %v445_v17 = vsub.f32 %v1349_v30, %v435_v61 }
  0x70   : > { %v446_v19 = vmul.f32 %v438_v10, %v438_v10  ;;  %v448_v20 = vmul.f32 %v440_v11, %v440_v11  ;;  %v450_v7 = vmul.f32 %v442_v12, %v442_v12  ;;  %v452_v21 = vmul.f32 %v444_v13, %v444_v13 }
  0x71   : > { %v447_v22 = vmul.f32 %v439_v14, %v439_v14  ;;  %v449_v25 = vmul.f32 %v441_v15, %v441_v15  ;;  %v451_v31 = vmul.f32 %v443_v16, %v443_v16  ;;  %v453_v26 = vmul.f32 %v445_v17, %v445_v17 }
  0x72   : > { %v462_v33 = vcombine.high %v446_v19, %v446_v19  ;;  %v469_v27 = vrot.slane %v446_v19, %v1323_v18  ;;  %v487_v28 = vcombine.high %v448_v20, %v448_v20  ;;  %v494_v23 = vrot.slane %v448_v20, %v1323_v18 }
  0x73   : > { %v485_v29 = vrot.slane %v447_v22, %v1323_v18  ;;  %v510_v24 = vrot.slane %v449_v25, %v1323_v18  ;;  %v512_v34 = vcombine.high %v450_v7, %v450_v7  ;;  %v519_v30 = vrot.slane %v450_v7, %v1323_v18 }
  0x74   : > { %v476_v35 = vrot.slane %v462_v33, %v1323_v18  ;;  %v477_v36 = vcombine.high %v469_v27, %v469_v27  ;;  %v501_v37 = vrot.slane %v487_v28, %v1323_v18  ;;  %v502_v40 = vcombine.high %v494_v23, %v494_v23 }
  0x75   : > { %v486_v41 = vcombine.high %v485_v29, %v485_v29  ;;  %v511_v42 = vcombine.high %v510_v24, %v510_v24  ;;  %v526_v43 = vrot.slane %v512_v34, %v1323_v18  ;;  %v527_v44 = vcombine.high %v519_v30, %v519_v30 }
  0x76   : > { %v478_v45 = vcombine.high %v476_v35, %v476_v35  ;;  %v503_v47 = vcombine.high %v501_v37, %v501_v37  ;;  %v535_v49 = vrot.slane %v451_v31, %v1323_v18  ;;  %v537_v50 = vcombine.high %v452_v21, %v452_v21 }
  0x77   : > { %v528_v51 = vcombine.high %v526_v43, %v526_v43  ;;  %v544_v52 = vrot.slane %v452_v21, %v1323_v18  ;;  %v560_v55 = vrot.slane %v453_v26, %v1323_v18  ;;  %v586_v32 = vsel %vm355_vm1, %v469_v27, 0.0 }
  0x78   : > { %v536_v56 = vcombine.high %v535_v49, %v535_v49  ;;  %v551_v39 = vrot.slane %v537_v50, %v1323_v18  ;;  %v587_v57 = vsel %vm355_vm1, %v494_v23, 0.0  ;;  %v589_v48 = vsel %vm355_vm1, %v519_v30, 0.0 }
  0x79   : > { %v552_v58 = vcombine.high %v544_v52, %v544_v52  ;;  %v561_v54 = vcombine.high %v560_v55, %v560_v55  ;;  %v588_v59 = vadd.f32 %v587_v57, %v586_v32  ;;  %v591_v38 = vsel %vm355_vm1, %v544_v52, 0.0 }
  0x7a   : > { %v553_v60 = vcombine.high %v551_v39, %v551_v39  ;;  %v593_v62 = vsel %vm355_vm1, %v477_v36, 0.0  ;;  %v594_v63 = vsel %vm355_vm1, %v502_v40, 0.0  ;;  %v596_v46 = vsel %vm355_vm1, %v527_v44, 0.0 }
  0x7b   : > { %v590_v6 = vadd.f32 %v589_v48, %v588_v59  ;;  %v595_v53 = vadd.f32 %v594_v63, %v593_v62  ;;  %v598_v18 = vsel %vm355_vm1, %v552_v58, 0.0  ;;  %v600_v8 = vsel %vm355_vm1, %v476_v35, 0.0 }
  0x7c   : > { %v601_v61 = vsel %vm355_vm1, %v501_v37, 0.0  ;;  %v603_v10 = vsel %vm355_vm1, %v526_v43, 0.0  ;;  %v605_v11 = vsel %vm355_vm1, %v551_v39, 0.0  ;;  %v607_v12 = vsel %vm355_vm1, %v478_v45, 0.0 }
  0x7d   : > { %v592_v13 = vadd.f32 %v591_v38, %v590_v6  ;;  %v597_v14 = vadd.f32 %v596_v46, %v595_v53  ;;  %v602_v15 = vadd.f32 %v601_v61, %v600_v8  ;;  %v608_v16 = vsel %vm355_vm1, %v503_v47, 0.0 }
  0x7e   : > { %v609_v17 = vadd.f32 %v608_v16, %v607_v12  ;;  %v610_v19 = vsel %vm355_vm1, %v528_v51, 0.0  ;;  %v612_v20 = vsel %vm355_vm1, %v553_v60, 0.0  ;;  %v614_v7 = vsel %vm355_vm1, %v485_v29, 0.0 }
  0x7f   : > { %v599_v21 = vadd.f32 %v598_v18, %v597_v14  ;;  %v604_v22 = vadd.f32 %v603_v10, %v602_v15  ;;  %v615_v25 = vsel %vm355_vm1, %v510_v24, 0.0  ;;  %v617_v31 = vsel %vm355_vm1, %v535_v49, 0.0 }
  0x80   : > { %v611_v26 = vadd.f32 %v610_v19, %v609_v17  ;;  %v616_v33 = vadd.f32 %v615_v25, %v614_v7  ;;  %v621_v27 = vsel %vm355_vm1, %v486_v41, 0.0  ;;  %v690_v28 = vstv %s682_s23 }
  0x81   : > { %v606_v23 = vadd.f32 %v605_v11, %v604_v22  ;;  %v619_v34 = vsel %vm355_vm1, %v560_v55, 0.0  ;;  %v622_v30 = vsel %vm355_vm1, %v511_v42, 0.0  ;;  %v624_v35 = vsel %vm355_vm1, %v536_v56, 0.0 }
  0x82   : > { %v613_v36 = vadd.f32 %v612_v20, %v611_v26  ;;  %v618_v29 = vadd.f32 %v617_v31, %v616_v33  ;;  %v623_v37 = vadd.f32 %v622_v30, %v621_v27  ;;  %v628_v40 = vmul.f32 0.25, %v592_v13 }
  0x83   : > { %v626_v24 = vsel %vm355_vm1, %v561_v54, 0.0  ;;  %v629_v43 = vmul.f32 0.25, %v599_v21  ;;  %v630_v44 = vmul.f32 0.25, %v606_v23  ;;  %v685_v45 = vadd.s32 128, %v1399_v9 }
  0x84   : > { %v620_v47 = vadd.f32 %v619_v34, %v618_v29  ;;  %v625_v41 = vadd.f32 %v624_v35, %v623_v37  ;;  %v631_v49 = vmul.f32 0.25, %v613_v36  ;;  %v634_v50 = vadd.f32 1e-08, %v628_v40 }
  0x85   : > { %v635_v51 = vadd.f32 1e-08, %v629_v43  ;;  %v1447_v52 = vadd.f32 1e-08, %v630_v44  ;;  %v686_v42 = vadd.s32 256, %v1399_v9  ;;  %v687_v55 = vadd.s32 384, %v1399_v9 }
  0x86   : > { %v627_v32 = vadd.f32 %v626_v24, %v625_v41  ;;  %v632_v56 = vmul.f32 0.25, %v620_v47  ;;  %v1451_v39 = vadd.f32 1e-08, %v631_v49  ;;  %1007 = vrsqrt.f32 %v634_v50 }
  0x87   : > { %1009 = vrsqrt.f32 %v635_v51  ;;  %v688_v57 = vadd.s32 512, %v1399_v9  ;;  %v689_v54 = vadd.s32 640, %v1399_v9  ;;  %v691_v59 = vadd.s32 %v690_v28, %v1399_v9 }
  0x88   : > { %v633_v48 = vmul.f32 0.25, %v627_v32  ;;  %v1454_v58 = vadd.f32 1e-08, %v632_v56  ;;  %1011 = vrsqrt.f32 %v1447_v52  ;;  %v692_v38 = vadd.s32 %v690_v28, %v685_v45 }
  0x89   : > { %1013 = vrsqrt.f32 %v1451_v39  ;;  %v693_v62 = vadd.s32 %v690_v28, %v686_v42  ;;  %v694_v63 = vadd.s32 %v690_v28, %v687_v55  ;;  %v695_v46 = vadd.s32 %v690_v28, %v688_v57  ;;  %v721_v57 = vld [vmem:[#allocation2] sm:$0x3] }
  0x8a   : > { %v1459_v60 = vadd.f32 1e-08, %v633_v48  ;;  %1015 = vrsqrt.f32 %v1454_v58  ;;  %v696_v6 = vadd.s32 %v690_v28, %v689_v54  ;;  %vm697_vm2 = vcmp.lt.s32.totalorder %v691_v59, 768 }
  0x8b   : > { %vm698_vm3 = vcmp.lt.s32.totalorder %v692_v38, 768  ;;  %vm699_vm4 = vcmp.lt.s32.totalorder %v693_v62, 768  ;;  %vm642_vm6 = vcmp.eq.f32.partialorder %v634_v50, inf  ;;  %vm644_vm7 = vcmp.eq.f32.partialorder %v634_v50, 0.0 }
  0x8c   : > { %1017 = vrsqrt.f32 %v1459_v60  ;;  %v645_v9 = vand.u32 2147483648, %v634_v50  ;;  %vm649_vm9 = vcmp.eq.f32.partialorder %v635_v51, inf  ;;  %vm651_vm10 = vcmp.eq.f32.partialorder %v635_v51, 0.0 }
  0x8d   : > { %v652_v18 = vand.u32 2147483648, %v635_v51  ;;  %vm656_vm11 = vcmp.eq.f32.partialorder %v1447_v52, inf  ;;  %vm658_vm13 = vcmp.eq.f32.partialorder %v1447_v52, 0.0  ;;  %v659_v10 = vand.u32 2147483648, %v1447_v52 }
  0x8e   : > { %vm663_vm14 = vcmp.eq.f32.partialorder %v1451_v39, inf  ;;  %vm665_vm15 = vcmp.eq.f32.partialorder %v1451_v39, 0.0  ;;  %v666_v12 = vand.u32 2147483648, %v1451_v39  ;;  %vm670_vm0 = vcmp.eq.f32.partialorder %v1454_v58, inf }
  0x8f   : > { %vm672_vm12 = vcmp.eq.f32.partialorder %v1454_v58, 0.0  ;;  %v673_v15 = vand.u32 2147483648, %v1454_v58  ;;  %vm677_vm8 = vcmp.eq.f32.partialorder %v1459_v60, inf  ;;  %vm679_vm5 = vcmp.eq.f32.partialorder %v1459_v60, 0.0 }
  0x90   : > { %v1008_v53 = vpop.eup %1007  ;;  %v680_v25 = vand.u32 2147483648, %v1459_v60 }
  0x91   : > { %v1010_v8 = vpop.eup %1009  ;;  %v641_v61 = vmul.f32 %v1008_v53, %v634_v50 }
  0x92   : > { %v648_v11 = vmul.f32 %v1010_v8, %v635_v51  ;;  %v1012_v13 = vpop.eup %1011 }
  0x93   : > { %v643_v14 = vsel %vm642_vm6, %v634_v50, %v641_v61  ;;  %v1014_v16 = vpop.eup %1013  ;;  %v655_v20 = vmul.f32 %v1012_v13, %v1447_v52  ;;  %vm736_vm6 = vcmask 1024  }
  0x94   : > { %v646_v17 = vsel %vm644_vm7, %v645_v9, %v643_v14  ;;  %v650_v19 = vsel %vm649_vm9, %v635_v51, %v648_v11  ;;  %v1016_v7 = vpop.eup %1015  ;;  %v662_v22 = vmul.f32 %v1014_v16, %v1451_v39 }
  0x95   : > { %v653_v21 = vsel %vm651_vm10, %v652_v18, %v650_v19  ;;  %v715_v31 = vsel %vm697_vm2, %v646_v17, 0.0  ;;  %v657_v33 = vsel %vm656_vm11, %v1447_v52, %v655_v20  ;;  %v669_v27 = vmul.f32 %v1016_v7, %v1454_v58 }
  0x96   : > { %v1018_v26 = vpop.eup %1017  ;;  %v716_v28 = vsel %vm698_vm3, %v653_v21, 0.0  ;;  %v722_v23 = vsel %vm355_vm1, %v715_v31, 0.0  ;;  %v660_v34 = vsel %vm658_vm13, %v659_v10, %v657_v33  ;;  %v664_v30 = vsel %vm663_vm14, %v1451_v39, %v662_v22 }
  0x97   : > { %v676_v35 = vmul.f32 %v1018_v26, %v1459_v60  ;;  %v723_v36 = vsel %vm355_vm1, %v716_v28, 0.0  ;;  %v667_v29 = vsel %vm665_vm15, %v666_v12, %v664_v30  ;;  %v671_v37 = vsel %vm670_vm0, %v1454_v58, %v669_v27 }
  0x98   : > { %v717_v40 = vsel %vm699_vm4, %v660_v34, 0.0  ;;  %v724_v24 = vadd.f32 %v723_v36, %v722_v23  ;;  %v674_v43 = vsel %vm672_vm12, %v673_v15, %v671_v37  ;;  %vm1617_vm2 = vcmp.lt.s32.totalorder %v694_v63, 768 }
  0x99   : > { %v678_v44 = vsel %vm677_vm8, %v1459_v60, %v676_v35  ;;  %v718_v45 = vsel %vm1617_vm2, %v667_v29, 0.0  ;;  %v725_v47 = vsel %vm355_vm1, %v717_v40, 0.0  ;;  %vm1618_vm3 = vcmp.lt.s32.totalorder %v695_v46, 768 }
  0x9a   : > { %v681_v41 = vsel %vm679_vm5, %v680_v25, %v678_v44  ;;  %v719_v49 = vsel %vm1618_vm3, %v674_v43, 0.0  ;;  %v726_v50 = vadd.f32 %v725_v47, %v724_v24  ;;  %v727_v51 = vsel %vm355_vm1, %v718_v45, 0.0 }
  0x9b   : > { %vm1619_vm4 = vcmp.lt.s32.totalorder %v696_v6, 768  ;;  %v729_v42 = vsel %vm355_vm1, %v719_v49, 0.0 }
  0x9c   : > { %v720_v52 = vsel %vm1619_vm4, %v681_v41, 0.0  ;;  %v728_v55 = vadd.f32 %v727_v51, %v726_v50 }
  0x9d   : > { %v731_v32 = vsel %vm355_vm1, %v720_v52, 0.0 }
  0x9e   : > { %v730_v56 = vadd.f32 %v729_v42, %v728_v55 }
  0xa0   : > { %v732_v39 = vadd.f32 %v731_v32, %v730_v56 }
  0xa2   : > { %733 = vadd.xlane.f32.xlu0 %v732_v39 }
 0x12f   : > { %v734_v48 = vpop.xlane.xlu0 %733 }
 0x130   : > { %v735_v58 = vadd.f32 %v734_v48, %v721_v57 }
 0x132   : > { %737 = vst.msk [vmem:[#allocation2] sm:$0x3] %vm736_vm6, %v735_v58 }
 0x133 PF: > { %s738_s16 = sadd.s32 1, %s1191_s13 }
 0x134   : > { %s739_s19 = smul.u32 768, %s738_s16 }
 0x136   : > { %p921_p3 = scmp.gt.s32.totalorder %s739_s19, 768 }
 0x137   : > { %744 = vst [vmem:[%s1306_s14] sm:$0xff] (!%p921_p3), %v1294_v0  ;;  %745 = vst [vmem:[%s1306_s14 + $0x8] sm:$0xff] (!%p921_p3), %v1296_v1 }
 0x138   : > { %743 = sbr.rel (%p921_p3) target bundleno = 319 (0x13f), region = 40  ;;  %746 = vst [vmem:[%s1306_s14 + $0x10] sm:$0xff] (!%p921_p3), %v1298_v2  ;;  %747 = vst [vmem:[%s1306_s14 + $0x18] sm:$0xff] (!%p921_p3), %v1300_v3 }
 0x139   : > { %748 = vst [vmem:[%s1306_s14 + $0x20] sm:$0xff] (!%p921_p3), %v1302_v4  ;;  %749 = vst [vmem:[%s1306_s14 + $0x28] sm:$0xff] (!%p921_p3), %v1304_v5 }
 0x13f PF: > { %p922_p4 = scmp.le.s32.totalorder %s739_s19, 768 }
 0x140   : > { %v754_v54 = vld [vmem:[#allocation2] sm:$0x3] (!%p922_p4)  ;;  %v1145_v59 = vmov (!%p922_p4), 0   ;;  %vm763_vm1 = vcmask (!%p922_p4), 1041408   ;;  %vm765_vm5 = vcmask (!%p922_p4), 1043456   ;;  %vm767_vm7 = vcmask (!%p922_p4), 1045504  }
 0x141   : > { %753 = sbr.rel (%p922_p4) target bundleno = 460 (0x1cc), region = 44  ;;  %1019 = vset.pattern.permute.xlu0 (!%p922_p4), %v1145_v59  ;;  %v755_v38 = vmul.f32 (!%p922_p4), 0.0013020834, %v754_v54  ;;  %v775_v53 = vlaneseq (!%p922_p4) }
 0x142   : > { %s774_s20 = smul.u32 (!%p922_p4), 768, %s1191_s13 }
 0x143   : > { %v757_v60 = vrot.slane (!%p922_p4), %v755_v38, 6  ;;  %v759_v62 = vrot.slane (!%p922_p4), %v755_v38, 4  ;;  %v761_v63 = vrot.slane (!%p922_p4), %v755_v38, 2  ;;  %v776_v18 = vand.u32 (!%p922_p4), 127, %v775_v53 }
 0x144   : > { %v782_v13 = vstv (!%p922_p4), %s774_s20 }
 0x145   : > { %v764_v46 = vsel (!%p922_p4), %vm763_vm1, %v755_v38, %v757_v60  ;;  %v777_v8 = vadd.s32 (!%p922_p4), 128, %v776_v18  ;;  %v778_v61 = vadd.s32 (!%p922_p4), 256, %v776_v18  ;;  %v779_v10 = vadd.s32 (!%p922_p4), 384, %v776_v18 }
 0x146   : > { %v766_v6 = vsel (!%p922_p4), %vm765_vm5, %v764_v46, %v759_v62  ;;  %v780_v11 = vadd.s32 (!%p922_p4), 512, %v776_v18  ;;  %v781_v12 = vadd.s32 (!%p922_p4), 640, %v776_v18  ;;  %v783_v14 = vadd.s32 (!%p922_p4), %v782_v13, %v776_v18 }
 0x147   : > { %v768_v9 = vsel (!%p922_p4), %vm767_vm7, %v766_v6, %v761_v63  ;;  %v784_v15 = vadd.s32 (!%p922_p4), %v782_v13, %v777_v8  ;;  %v785_v16 = vadd.s32 (!%p922_p4), %v782_v13, %v778_v61  ;;  %v786_v17 = vadd.s32 (!%p922_p4), %v782_v13, %v779_v10 }
 0x148   : > { %771 = vperm.xlu0 %1019, %v768_v9   ;;  %v787_v19 = vadd.s32 %v782_v13, %v780_v11  ;;  %v788_v20 = vadd.s32 %v782_v13, %v781_v12  ;;  %vm789_vm8 = vcmp.lt.s32.totalorder %v783_v14, 768 }
 0x149   : > { %vm790_vm9 = vcmp.lt.s32.totalorder %v784_v15, 768  ;;  %vm791_vm10 = vcmp.lt.s32.totalorder %v785_v16, 768  ;;  %vm792_vm11 = vcmp.lt.s32.totalorder %v786_v17, 768 }
 0x14a   : > { %vm793_vm12 = vcmp.lt.s32.totalorder %v787_v19, 768  ;;  %vm794_vm13 = vcmp.lt.s32.totalorder %v788_v20, 768 }
 0x1c7   : > { %v772_v7 = vpop.permute.xlu0 %771 }
 0x1c8   : > { %v807_v21 = vsel %vm789_vm8, %v1294_v0, %v772_v7  ;;  %v808_v22 = vsel %vm790_vm9, %v1296_v1, %v772_v7  ;;  %v809_v25 = vsel %vm791_vm10, %v1298_v2, %v772_v7  ;;  %v810_v31 = vsel %vm792_vm11, %v1300_v3, %v772_v7 }
 0x1c9   : > { %v811_v26 = vsel %vm793_vm12, %v1302_v4, %v772_v7  ;;  %v812_v33 = vsel %vm794_vm13, %v1304_v5, %v772_v7  ;;  %813 = vst [vmem:[%s1306_s14] sm:$0xff] %v807_v21  ;;  %814 = vst [vmem:[%s1306_s14 + $0x8] sm:$0xff] %v808_v22 }
 0x1ca   : > { %815 = vst [vmem:[%s1306_s14 + $0x10] sm:$0xff] %v809_v25  ;;  %816 = vst [vmem:[%s1306_s14 + $0x18] sm:$0xff] %v810_v31 }
 0x1cb   : > { %817 = vst [vmem:[%s1306_s14 + $0x20] sm:$0xff] %v811_v26  ;;  %818 = vst [vmem:[%s1306_s14 + $0x28] sm:$0xff] %v812_v33 }
 0x1cc PF: > { %s1544_s21 = scalar_lea.sflag [#allocation5], %s136_s2  ;;  %p1620_p10 = scmp.ne.s32.totalorder %s1613_s26, 0 }
 0x1cd   : > { %s827_s24 = smul.u32 (%p1620_p10), 6, %s1191_s13 }
 0x1ce   : > { %826 = sbr.rel (!%p1620_p10) target bundleno = 496 (0x1f0), region = 48 }
 0x1cf   : > { %s828_s28 = ssub.s32 (%p1620_p10), 7, %s827_s24 }
 0x1d0   : > { %p829_p2 = scmp.lt.s32.totalorder (%p1620_p10), %s828_s28, 6 }
 0x1d5   : > { %s1631_s28 = smov (!%p829_p2, %s828_s28), 6 }
 0x1d6   : > { %s1549_s29 = sshll.u32 %s1631_s28, 7 }
 0x1d7   : > { %s833_s30 = ssub.s32 768, %s1549_s29 }
 0x1d8   : > { %834 = vsyncadd %s1544_s21, %s833_s30  ;;  %p924_p6 = scmp.ne.s32.totalorder %s1549_s29, 0  ;;  %s931_s3 = smul.u32 768, %s1191_s13 }
 0x1d9   : > { %s840_s26 = sshll.u32 %s1306_s14, 4  ;;  %s1146_s2 = smov [#allocation6]   ;;  %s841_s26 = int_to_ptr.vmem [resolvable:$true] %s840_s26 }
 0x1da   : > { %s1559_s17 = scalar_lea.hbm %s1610_s1, %s931_s3  ;;  %s1050_s18 = scalar_lea.vmem %s841_s26, %s1549_s29 }
 0x1db   : > { %p1051_p9 = scmp.ne.s32.totalorder %s841_s26, %s1050_s18  ;;  %s1054_s5 = sshll.u32 %s1146_s2, 4  ;;  %s1055_s5 = int_to_ptr.vmem [resolvable:$false] %s1054_s5 }
 0x1dc   : > { %s1056_s23 = scalar_lea.vmem %s1055_s5, 1536  ;;  %p1057_p13 = scmp.lt.s32.totalorder %s841_s26, %s1055_s5 }
 0x1dd   : > { %p1052_p11 = pnand %p1051_p9, %p924_p6  ;;  %p1058_p0 = scmp.lt.s32.totalorder %s1056_s23, %s1050_s18 }
 0x1df   : > { %p1053_p12 = pneg %p1052_p11  ;;  %p1059_p5 = por %p1058_p0, %p1057_p13 }
 0x1e1   : > { %p1060_p7 = pnand %p1059_p5, %p1053_p12 }
 0x1e3   : > { %1063 = shalt.err (!%p1060_p7)
}
 0x1e4   : > { %s1064_s13 = scalar_lea.hbm %s1559_s17, %s1549_s29  ;;  %s1068_s19 = scalar_lea.hbm %s1610_s1, 896 }
 0x1e5   : > { %p1065_p8 = scmp.ne.s32.totalorder %s1559_s17, %s1064_s13  ;;  %p1069_p4 = scmp.lt.u32.totalorder %s1559_s17, %s1610_s1 }
 0x1e6   : > { %p1070_p10 = scmp.lt.u32.totalorder %s1068_s19, %s1064_s13  ;;  %p1072_p9 = scmp.lt.u32.totalorder %s1064_s13, %s1559_s17 }
 0x1e7   : > { %p1066_p1 = pnand %p1065_p8, %p924_p6 }
 0x1e8   : > { %p1071_p2 = por %p1070_p10, %p1069_p4 }
 0x1e9   : > { %p1067_p3 = pneg %p1066_p1 }
 0x1ea   : > { %p1073_p11 = por %p1072_p9, %p1071_p2 }
 0x1ec   : > { %p1074_p12 = pnand %p1073_p11, %p1067_p3 }
 0x1ee   : > { %1077 = shalt.err (!%p1074_p12)
}
 0x1ef   : > { %843 = dma.vmem_to_hbm [thread:$0]  (%p924_p6), %s841_s26, %s1549_s29, %s1559_s17, %s1544_s21  }
 0x1f0 PF: > { %s852_s28 = sand.u32 1, %s1116_s6   ;;  %p1621_p13 = scmp.ne.s32.totalorder %s1614_s27, 0 }
 0x1f1   : > { %p1622_p0 = scmp.ge.s32.totalorder %s1140_s12, 2  ;;  %s853_s30 = scalar_lea.sflag [#allocation5], %s852_s28 }
 0x1f3   : > { %p943_p5 = pnand %p1622_p0, %p1621_p13 }
 0x1f5   : > { %1111 = dma.done.wait (!%p943_p5), %s853_s30, 768  }
 0x1f6   : > { %1113 = vsyncadd (!%p943_p5), %s853_s30, 4294966528  ;;  %p14_p6 = scmp.ge.s32.totalorder %s1195_s15, 4   ;;  %s1623_s6 = smov %s1120_s7 }
 0x1f7   : > { %s1624_s7 = smov %s1124_s8  ;;  %s1625_s8 = smov %s1227_s25 }
 0x1f8   : > { %s1626_s9 = smov %s1132_s10  ;;  %s1627_s10 = smov %s1136_s11 }
 0x1f9   : > { %s1628_s11 = smov %s1217_s22  ;;  %s1629_s12 = smov %s1195_s15 }
 0x1fa   :  { %16 = sbr.rel (!%p14_p6) target bundleno = 7 (0x7), region = 85 }
 0x201   :  { %858 = vsyncpa [#allocation4], 1 }
 0x202   :  { %860 = vsyncpa [#allocation4 + $0x1], 1 }
 0x203   :  { %861 = vsyncpa [#allocation5], 1 }
 0x204   :  { %863 = vsyncpa [#allocation5 + $0x1], 1 }

</bundles_post_ra>
